<compile_context>
chip_gen: v5e
topology: v5e:2x2
jax: 0.10.0
libtpu: 0.0.40
codegen_flags: <defaults>
</compile_context>

<pallas_src>
import jax
import jax.numpy as jnp
from jax.experimental import pallas as pl
from jax.experimental.pallas import tpu as pltpu


def _round_up(n, m):
    return ((n + m - 1) // m) * m


def _num_tensorcores():
    """TensorCores per chip (v7x: 2, v5e/v6e: 1).  Conservative fallback: 1."""
    try:
        info = pltpu.get_tpu_info()
        for attr in ("num_cores", "core_count", "num_tensorcores",
                     "tensorcores_per_chip", "cores_per_chip"):
            n = getattr(info, attr, None)
            if n is not None:
                n = int(n)
                if n > 0:
                    return n
    except Exception:
        pass
    try:
        kind = jax.devices()[0].device_kind.lower()
        if "v7" in kind:
            return 2
    except Exception:
        pass
    return 1


def _mlp_kernel(x_ref,
                w1_ref, b1_ref,
                w2_ref, b2_ref,
                w3_ref, b3_ref,
                w4_ref, b4_ref,
                o_ref):
    """Fused 4-layer MLP: relu(x@W1+b1) -> relu(@W2+b2) -> relu(@W3+b3) -> @W4+b4."""
    # hidder1 + ReLU  (bf16 matmul, f32 accumulation / bias / relu)
    h = jnp.dot(x_ref[...], w1_ref[...], preferred_element_type=jnp.float32)
    h = jnp.maximum(h + b1_ref[...], 0.0)
    # hidder2 + ReLU
    h = jnp.dot(h.astype(w2_ref.dtype), w2_ref[...],
                preferred_element_type=jnp.float32)
    h = jnp.maximum(h + b2_ref[...], 0.0)
    # hidder3 + ReLU
    h = jnp.dot(h.astype(w3_ref.dtype), w3_ref[...],
                preferred_element_type=jnp.float32)
    h = jnp.maximum(h + b3_ref[...], 0.0)
    # out (no activation) -- lane-dense (padded) output width
    o = jnp.dot(h.astype(w4_ref.dtype), w4_ref[...],
                preferred_element_type=jnp.float32) + b4_ref[...]
    o_ref[...] = o.astype(o_ref.dtype)


def net_forward(x, params, *, tile_b=1024, compute_dtype=jnp.bfloat16,
                out_dtype=None, return_padded=False):
    """Pallas forward pass of Net.

    x: (B, in_feature) float32.
    out_dtype:     None -> x.dtype (f32, matches PyTorch); jnp.bfloat16 halves the
                   kernel writeback (final accumulation/bias still f32).
    return_padded: if True, return the (b_pad, 128-padded) slab directly (no
                   post-kernel slice copy; caller slices / fuses downstream).
    """
    (w1, b1), (w2, b2), (w3, b3), (w4, b4) = params
    B, in_f = x.shape
    out_f = w4.shape[1]
    out_dtype = x.dtype if out_dtype is None else jnp.dtype(out_dtype)

    # --- lane-dense output: pad the final layer out to a multiple of 128 lanes ---
    out_pad = _round_up(out_f, 128)
    if out_pad != out_f:
        w4 = jnp.pad(w4, ((0, 0), (0, out_pad - out_f)))
        b4 = jnp.pad(b4, ((0, 0), (0, out_pad - out_f)))

    # --- batch tiling (16-row multiples keep bf16 sublane packing happy) ---
    n_tc = _num_tensorcores()
    tb = max(16, min(_round_up(tile_b, 16), _round_up(B, 16)))
    grid_b = pl.cdiv(B, tb)
    if n_tc > 1 and grid_b % n_tc != 0 and B > 16 * n_tc:
        # Multi-TC chips (v7x): make the tile count a multiple of the TC count so the
        # "parallel" batch axis shards evenly across cores (no idle-core tail step).
        target_grid = _round_up(grid_b, n_tc)
        tb_new = _round_up(pl.cdiv(B, target_grid), 16)
        grid_b_new = pl.cdiv(B, tb_new)
        if grid_b_new % n_tc == 0:
            tb, grid_b = tb_new, grid_b_new
    # Single-TC chips (v5e/v6e): no splitting -- one big tile per grid step.
    b_pad = grid_b * tb
    if b_pad != B:
        x = jnp.pad(x, ((0, b_pad - B), (0, 0)))

    # --- bf16 matmul inputs; biases kept in f32 (added after f32 accumulation) ---
    xc = x.astype(compute_dtype)
    w1c, w2c, w3c, w4c = (w.astype(compute_dtype) for w in (w1, w2, w3, w4))
    b1f, b2f, b3f, b4f = (b.astype(jnp.float32) for b in (b1, b2, b3, b4))

    def x_map(i):
        return (i, 0)

    def rep_map(i):  # weights / biases: same block for every batch tile
        return (0, 0)

    in_specs = [
        pl.BlockSpec((tb, in_f), x_map),
        pl.BlockSpec(w1c.shape, rep_map), pl.BlockSpec(b1f.shape, rep_map),
        pl.BlockSpec(w2c.shape, rep_map), pl.BlockSpec(b2f.shape, rep_map),
        pl.BlockSpec(w3c.shape, rep_map), pl.BlockSpec(b3f.shape, rep_map),
        pl.BlockSpec(w4c.shape, rep_map), pl.BlockSpec(b4f.shape, rep_map),
    ]
    out_spec = pl.BlockSpec((tb, out_pad), x_map)

    d1, d2, d3 = w1.shape[1], w2.shape[1], w3.shape[1]
    flops = 2 * b_pad * (in_f * d1 + d1 * d2 + d2 * d3 + d3 * out_pad)
    bytes_accessed = (
        int(xc.size) * xc.dtype.itemsize
        + sum(int(a.size) * a.dtype.itemsize
              for a in (w1c, w2c, w3c, w4c, b1f, b2f, b3f, b4f))
        + b_pad * out_pad * jnp.dtype(out_dtype).itemsize
    )
    cost = pl.CostEstimate(flops=int(flops), transcendentals=0,
                           bytes_accessed=int(bytes_accessed))

    out = pl.pallas_call(
        _mlp_kernel,
        out_shape=jax.ShapeDtypeStruct((b_pad, out_pad), out_dtype),
        grid_spec=pltpu.PrefetchScalarGridSpec(
            num_scalar_prefetch=0,
            grid=(grid_b,),
            in_specs=in_specs,
            out_specs=out_spec,
        ),
        compiler_params=pltpu.CompilerParams(
            dimension_semantics=("parallel",),
            # Explicit >= 32 MiB so v5e's 16 MiB scoped default never constrains tiles.
            vmem_limit_bytes=32 * 1024 * 1024,
        ),
        cost_estimate=cost,
    )(xc, w1c, b1f, w2c, b2f, w3c, b3f, w4c, b4f)

    if return_padded:
        return out  # (b_pad, out_pad) slab; slice / fuse at the consumer.
    # Strip batch padding and the lane-dense output padding.
    return out[:B, :out_f]


def init_params(key, in_feature, out_feature):
    """Deterministic init mirroring the layer shapes in Net.__init__.

    Weights are created directly in (in_dim, out_dim) layout (i.e. already
    transposed relative to PyTorch's (out_dim, in_dim) storage).
    """
    dims = [(in_feature, 256), (256, 512), (512, 256), (256, out_feature)]
    params = []
    for (din, dout) in dims:
        key, kw, kb = jax.random.split(key, 3)
        bound = 1.0 / (din ** 0.5)  # same scale as PyTorch's default Linear init
        w = jax.random.uniform(kw, (din, dout), jnp.float32, -bound, bound)
        b = jax.random.uniform(kb, (1, dout), jnp.float32, -bound, bound)
        params.append((w, b))
    return params


def reference_forward(x, params):
    """Pure-JAX f32 reference for correctness checking."""
    (w1, b1), (w2, b2), (w3, b3), (w4, b4) = params
    h = jnp.maximum(x @ w1 + b1, 0.0)
    h = jnp.maximum(h @ w2 + b2, 0.0)
    h = jnp.maximum(h @ w3 + b3, 0.0)
    return h @ w4 + b4


if __name__ == "__main__":
    key = jax.random.PRNGKey(0)
    in_feature = 32
    out_feature = 10

    kx, kx2, kp = jax.random.split(key, 3)
    params = init_params(kp, in_feature, out_feature)

    # Small-batch case (single tile, padded to 16 rows).
    batch = 8
    x = jax.random.normal(kx, (batch, in_feature), jnp.float32)
    out = net_forward(x, params)
    out = jax.block_until_ready(out)
    ref = reference_forward(x, params)
    assert out.shape == (batch, out_feature)
    assert out.dtype == x.dtype
    # bf16 matmul inputs with f32 accumulation: expect ~1e-2-level agreement vs f32 ref.
    assert jnp.allclose(out, ref, atol=5e-2, rtol=5e-2), "Pallas output mismatch vs reference"

    # Ragged, multi-tile-capable batch: exercises padding and the TC-aware tiling path.
    batch2 = 300
    x2 = jax.random.normal(kx2, (batch2, in_feature), jnp.float32)
    out2 = jax.block_until_ready(net_forward(x2, params, tile_b=256))
    ref2 = reference_forward(x2, params)
    assert out2.shape == (batch2, out_feature)
    assert jnp.allclose(out2, ref2, atol=5e-2, rtol=5e-2), "Pallas output mismatch vs reference (tiled)"

    print("KERNEL_OK")
</pallas_src>

<mosaic_0001>
module attributes {stable_mosaic.version = 11 : i64} {
  func.func @_mlp_kernel(%arg0: i32, %arg1: memref<16x32xbf16, #tpu.memory_space<vmem>>, %arg2: memref<32x256xbf16, #tpu.memory_space<vmem>>, %arg3: memref<1x256xf32, #tpu.memory_space<vmem>>, %arg4: memref<256x512xbf16, #tpu.memory_space<vmem>>, %arg5: memref<1x512xf32, #tpu.memory_space<vmem>>, %arg6: memref<512x256xbf16, #tpu.memory_space<vmem>>, %arg7: memref<1x256xf32, #tpu.memory_space<vmem>>, %arg8: memref<256x128xbf16, #tpu.memory_space<vmem>>, %arg9: memref<1x128xf32, #tpu.memory_space<vmem>>, %arg10: memref<16x128xf32, #tpu.memory_space<vmem>>) attributes {dimension_semantics = [#tpu.dimension_semantics<parallel>], iteration_bounds = array<i64: 1>, scalar_prefetch = 0 : i64, scratch_operands = 0 : i64, tpu.core_type = #tpu.core_type<tc>, window_params = [{transform_indices = @transform_0, window_bounds = array<i64: 16, 32>}, {pipeline_mode = #tpu.pipeline_mode<synchronous>, transform_indices = @transform_1, window_bounds = array<i64: 32, 256>}, {pipeline_mode = #tpu.pipeline_mode<synchronous>, transform_indices = @transform_2, window_bounds = array<i64: 1, 256>}, {pipeline_mode = #tpu.pipeline_mode<synchronous>, transform_indices = @transform_3, window_bounds = array<i64: 256, 512>}, {pipeline_mode = #tpu.pipeline_mode<synchronous>, transform_indices = @transform_4, window_bounds = array<i64: 1, 512>}, {pipeline_mode = #tpu.pipeline_mode<synchronous>, transform_indices = @transform_5, window_bounds = array<i64: 512, 256>}, {pipeline_mode = #tpu.pipeline_mode<synchronous>, transform_indices = @transform_6, window_bounds = array<i64: 1, 256>}, {pipeline_mode = #tpu.pipeline_mode<synchronous>, transform_indices = @transform_7, window_bounds = array<i64: 256, 128>}, {pipeline_mode = #tpu.pipeline_mode<synchronous>, transform_indices = @transform_8, window_bounds = array<i64: 1, 128>}, {transform_indices = @transform_9, window_bounds = array<i64: 16, 128>}]} {
    %c0 = arith.constant 0 : index
    %c0_0 = arith.constant 0 : index
    %0 = vector.load %arg1[%c0, %c0_0] : memref<16x32xbf16, #tpu.memory_space<vmem>>, vector<16x32xbf16>
    %c0_1 = arith.constant 0 : index
    %c0_2 = arith.constant 0 : index
    %1 = vector.load %arg2[%c0_1, %c0_2] : memref<32x256xbf16, #tpu.memory_space<vmem>>, vector<32x256xbf16>
    %cst = arith.constant dense<0.000000e+00> : vector<16x256xf32>
    %2 = tpu.matmul %0, %1, %cst {dimension_numbers = #tpu.dot_dimension_numbers<[1], [0], [0], [1], [0, 0, 1, 1], [], []>} : vector<16x32xbf16>, vector<32x256xbf16>, vector<16x256xf32> -> vector<16x256xf32>
    %c0_3 = arith.constant 0 : index
    %c0_4 = arith.constant 0 : index
    %3 = vector.load %arg3[%c0_3, %c0_4] : memref<1x256xf32, #tpu.memory_space<vmem>>, vector<1x256xf32>
    %4 = vector.broadcast %3 : vector<1x256xf32> to vector<16x256xf32>
    %5 = arith.addf %2, %4 : vector<16x256xf32>
    %cst_5 = arith.constant 0.000000e+00 : f32
    %6 = vector.broadcast %cst_5 : f32 to vector<16x256xf32>
    %7 = arith.maximumf %5, %6 : vector<16x256xf32>
    %8 = arith.truncf %7 : vector<16x256xf32> to vector<16x256xbf16>
    %c0_6 = arith.constant 0 : index
    %c0_7 = arith.constant 0 : index
    %9 = vector.load %arg4[%c0_6, %c0_7] : memref<256x512xbf16, #tpu.memory_space<vmem>>, vector<256x512xbf16>
    %cst_8 = arith.constant dense<0.000000e+00> : vector<16x512xf32>
    %10 = tpu.matmul %8, %9, %cst_8 {dimension_numbers = #tpu.dot_dimension_numbers<[1], [0], [0], [1], [0, 0, 1, 1], [], []>} : vector<16x256xbf16>, vector<256x512xbf16>, vector<16x512xf32> -> vector<16x512xf32>
    %c0_9 = arith.constant 0 : index
    %c0_10 = arith.constant 0 : index
    %11 = vector.load %arg5[%c0_9, %c0_10] : memref<1x512xf32, #tpu.memory_space<vmem>>, vector<1x512xf32>
    %12 = vector.broadcast %11 : vector<1x512xf32> to vector<16x512xf32>
    %13 = arith.addf %10, %12 : vector<16x512xf32>
    %cst_11 = arith.constant 0.000000e+00 : f32
    %14 = vector.broadcast %cst_11 : f32 to vector<16x512xf32>
    %15 = arith.maximumf %13, %14 : vector<16x512xf32>
    %16 = arith.truncf %15 : vector<16x512xf32> to vector<16x512xbf16>
    %c0_12 = arith.constant 0 : index
    %c0_13 = arith.constant 0 : index
    %17 = vector.load %arg6[%c0_12, %c0_13] : memref<512x256xbf16, #tpu.memory_space<vmem>>, vector<512x256xbf16>
    %cst_14 = arith.constant dense<0.000000e+00> : vector<16x256xf32>
    %18 = tpu.matmul %16, %17, %cst_14 {dimension_numbers = #tpu.dot_dimension_numbers<[1], [0], [0], [1], [0, 0, 1, 1], [], []>} : vector<16x512xbf16>, vector<512x256xbf16>, vector<16x256xf32> -> vector<16x256xf32>
    %c0_15 = arith.constant 0 : index
    %c0_16 = arith.constant 0 : index
    %19 = vector.load %arg7[%c0_15, %c0_16] : memref<1x256xf32, #tpu.memory_space<vmem>>, vector<1x256xf32>
    %20 = vector.broadcast %19 : vector<1x256xf32> to vector<16x256xf32>
    %21 = arith.addf %18, %20 : vector<16x256xf32>
    %cst_17 = arith.constant 0.000000e+00 : f32
    %22 = vector.broadcast %cst_17 : f32 to vector<16x256xf32>
    %23 = arith.maximumf %21, %22 : vector<16x256xf32>
    %24 = arith.truncf %23 : vector<16x256xf32> to vector<16x256xbf16>
    %c0_18 = arith.constant 0 : index
    %c0_19 = arith.constant 0 : index
    %25 = vector.load %arg8[%c0_18, %c0_19] : memref<256x128xbf16, #tpu.memory_space<vmem>>, vector<256x128xbf16>
    %cst_20 = arith.constant dense<0.000000e+00> : vector<16x128xf32>
    %26 = tpu.matmul %24, %25, %cst_20 {dimension_numbers = #tpu.dot_dimension_numbers<[1], [0], [0], [1], [0, 0, 1, 1], [], []>} : vector<16x256xbf16>, vector<256x128xbf16>, vector<16x128xf32> -> vector<16x128xf32>
    %c0_21 = arith.constant 0 : index
    %c0_22 = arith.constant 0 : index
    %27 = vector.load %arg9[%c0_21, %c0_22] : memref<1x128xf32, #tpu.memory_space<vmem>>, vector<1x128xf32>
    %28 = vector.broadcast %27 : vector<1x128xf32> to vector<16x128xf32>
    %29 = arith.addf %26, %28 : vector<16x128xf32>
    %c0_23 = arith.constant 0 : index
    %c0_24 = arith.constant 0 : index
    %30 = vector.load %arg10[%c0_23, %c0_24] : memref<16x128xf32, #tpu.memory_space<vmem>>, vector<16x128xf32>
    tpu.vector_store %arg10[%c0_23, %c0_24], %29 {strides = array<i32>} : memref<16x128xf32, #tpu.memory_space<vmem>>, vector<16x128xf32>,
    return
  }
  func.func @transform_0(%arg0: i32) -> (i32, i32) {
    %c0_i32 = arith.constant 0 : i32
    %c0_i32_0 = arith.constant 0 : i32
    return %arg0, %c0_i32 : i32, i32
  }
  func.func @transform_1(%arg0: i32) -> (i32, i32) {
    %c0_i32 = arith.constant 0 : i32
    %c0_i32_0 = arith.constant 0 : i32
    %c0_i32_1 = arith.constant 0 : i32
    return %c0_i32, %c0_i32_0 : i32, i32
  }
  func.func @transform_2(%arg0: i32) -> (i32, i32) {
    %c0_i32 = arith.constant 0 : i32
    %c0_i32_0 = arith.constant 0 : i32
    %c0_i32_1 = arith.constant 0 : i32
    return %c0_i32, %c0_i32_0 : i32, i32
  }
  func.func @transform_3(%arg0: i32) -> (i32, i32) {
    %c0_i32 = arith.constant 0 : i32
    %c0_i32_0 = arith.constant 0 : i32
    %c0_i32_1 = arith.constant 0 : i32
    return %c0_i32, %c0_i32_0 : i32, i32
  }
  func.func @transform_4(%arg0: i32) -> (i32, i32) {
    %c0_i32 = arith.constant 0 : i32
    %c0_i32_0 = arith.constant 0 : i32
    %c0_i32_1 = arith.constant 0 : i32
    return %c0_i32, %c0_i32_0 : i32, i32
  }
  func.func @transform_5(%arg0: i32) -> (i32, i32) {
    %c0_i32 = arith.constant 0 : i32
    %c0_i32_0 = arith.constant 0 : i32
    %c0_i32_1 = arith.constant 0 : i32
    return %c0_i32, %c0_i32_0 : i32, i32
  }
  func.func @transform_6(%arg0: i32) -> (i32, i32) {
    %c0_i32 = arith.constant 0 : i32
    %c0_i32_0 = arith.constant 0 : i32
    %c0_i32_1 = arith.constant 0 : i32
    return %c0_i32, %c0_i32_0 : i32, i32
  }
  func.func @transform_7(%arg0: i32) -> (i32, i32) {
    %c0_i32 = arith.constant 0 : i32
    %c0_i32_0 = arith.constant 0 : i32
    %c0_i32_1 = arith.constant 0 : i32
    return %c0_i32, %c0_i32_0 : i32, i32
  }
  func.func @transform_8(%arg0: i32) -> (i32, i32) {
    %c0_i32 = arith.constant 0 : i32
    %c0_i32_0 = arith.constant 0 : i32
    %c0_i32_1 = arith.constant 0 : i32
    return %c0_i32, %c0_i32_0 : i32, i32
  }
  func.func @transform_9(%arg0: i32) -> (i32, i32) {
    %c0_i32 = arith.constant 0 : i32
    %c0_i32_0 = arith.constant 0 : i32
    return %arg0, %c0_i32 : i32, i32
  }
}

</mosaic_0001>

<bundles_post_ra>
// kernel: tpu_custom_call.1
= control target key start
LH: loop header
LB: loop body
LE: loop exit
PB: predicated region body
PF: predicated region fallthrough
CT: control target
= control target key end

     0   :  { %14 = vsyncpa [#allocation3], 0  ;;  %s2499_s0 = inlined_call_operand.hbm [shape: bf16[16,32], index: 0, kind: input, shape index: {}]   ;;  %s2500_s1 = inlined_call_operand.hbm [shape: bf16[32,256], index: 1, kind: input, shape index: {}]   ;;  %s2501_s2 = inlined_call_operand.hbm [shape: f32[1,256], index: 2, kind: input, shape index: {}]   ;;  %s2502_s3 = inlined_call_operand.hbm [shape: bf16[256,512], index: 3, kind: input, shape index: {}]   ;;  %s2503_s4 = inlined_call_operand.hbm [shape: f32[1,512], index: 4, kind: input, shape index: {}]   ;;  %s2504_s5 = inlined_call_operand.hbm [shape: bf16[512,256], index: 5, kind: input, shape index: {}]   ;;  %s2505_s6 = inlined_call_operand.vmem [shape: f32[1,256], index: 6, kind: input, shape index: {}]   ;;  %s2506_s7 = inlined_call_operand.hbm [shape: bf16[256,128], index: 7, kind: input, shape index: {}]   ;;  %s2507_s8 = inlined_call_operand.vmem [shape: f32[1,128], index: 8, kind: input, shape index: {}]   ;;  %s2508_s9 = inlined_call_operand.hbm [shape: f32[16,128], index: 9, kind: output, shape index: {}]  }
   0x1   :  { %15 = vsyncpa [#allocation6], 0 }
   0x2   :  { %16 = vsyncpa [#allocation9], 0 }
   0x3   :  { %17 = vsyncpa [#allocation12], 0  ;;  %s36_s11 = sshll.u32 %s2500_s1, 4  ;;  %s37_s11 = int_to_ptr.hbm [resolvable:$true] %s36_s11 }
   0x4   :  { %18 = vsyncpa [#allocation4], 0  ;;  %s2388_s12 = smov [#allocation5]   ;;  %s60_s16 = sshll.u32 %s2502_s3, 4  ;;  %s61_s16 = int_to_ptr.hbm [resolvable:$true] %s60_s16 }
   0x5   :  { %s38_s13 = sshll.u32 %s2388_s12, 4  ;;  %s2389_s17 = smov 128   ;;  %s39_s13 = int_to_ptr.vmem [resolvable:$true] %s38_s13 }
   0x6   :  { %s2390_s18 = smov 8   ;;  %s2391_s19 = smov [#allocation8]  }
   0x7   :  { %44 = dma.hbm_to_vmem [thread:$0]  %s37_s11, 512, %s39_s13, [#allocation6], %s2389_s17, %s2389_s17, %s2390_s18  }
   0x8   :  { %s62_s20 = sshll.u32 %s2391_s19, 4  ;;  %s2392_s1 = smov 256   ;;  %s63_s20 = int_to_ptr.vmem [resolvable:$true] %s62_s20 }
   0x9   :  { %s2393_s21 = smov 16   ;;  %s84_s24 = sshll.u32 %s2504_s5, 4  ;;  %s85_s24 = int_to_ptr.hbm [resolvable:$true] %s84_s24 }
   0xa   :  { %68 = dma.hbm_to_vmem [thread:$0]  %s61_s16, 8192, %s63_s20, [#allocation9], %s2392_s1, %s2392_s1, %s2393_s21  }
   0xb   :  { %s2394_s25 = smov [#allocation11]   ;;  %s23_s28 = sshll.u32 %s2499_s0, 4  ;;  %s24_s28 = int_to_ptr.hbm [resolvable:$true] %s23_s28 }
   0xc   :  { %s86_s3 = sshll.u32 %s2394_s25, 4  ;;  %s2395_s29 = smov [#allocation2]   ;;  %s87_s3 = int_to_ptr.vmem [resolvable:$true] %s86_s3 }
   0xd   :  { %92 = dma.hbm_to_vmem [thread:$0]  %s85_s24, 8192, %s87_s3, [#allocation12], %s2389_s17, %s2389_s17, %s2390_s18  }
   0xe   :  { %s25_s30 = sshll.u32 %s2395_s29, 4  ;;  %s2396_s10 = smov 64   ;;  %s26_s30 = int_to_ptr.vmem [resolvable:$true] %s25_s30 }
   0xf   :  { %s2397_s11 = smov 4   ;;  %s50_s13 = sshll.u32 %s2501_s2, 4  ;;  %s51_s13 = int_to_ptr.hbm [resolvable:$true] %s50_s13 }
  0x10   :  { %31 = dma.hbm_to_vmem [thread:$0]  %s24_s28, 128, %s26_s30, [#allocation3], %s2396_s10, %s2396_s10, %s2397_s11  }
  0x11   :  { %s2398_s14 = smov [#allocation7]   ;;  %s74_s19 = sshll.u32 %s2503_s4, 4  ;;  %s75_s19 = int_to_ptr.hbm [resolvable:$true] %s74_s19 }
  0x12   :  { %s52_s15 = sshll.u32 %s2398_s14, 4  ;;  %s2399_s20 = smov [#allocation10]   ;;  %s53_s15 = int_to_ptr.vmem [resolvable:$true] %s52_s15 }
  0x13   :  { %55 = dma.hbm_to_vmem [thread:$0]  %s51_s13, 32, %s53_s15, [#allocation6]  }
  0x14   :  { %s76_s1 = sshll.u32 %s2399_s20, 4  ;;  %s99_s23 = sshll.u32 %s2506_s7, 4  ;;  %s77_s1 = int_to_ptr.vmem [resolvable:$true] %s76_s1  ;;  %s100_s23 = int_to_ptr.hbm [resolvable:$true] %s99_s23 }
  0x15   :  { %79 = dma.hbm_to_vmem [thread:$0]  %s75_s19, 64, %s77_s1, [#allocation9]  }
  0x16   :  { %s2400_s2 = smov [#allocation13]  }
  0x17   :  { %s101_s24 = sshll.u32 %s2400_s2, 4  ;;  %s102_s24 = int_to_ptr.vmem [resolvable:$true] %s101_s24 }
  0x18   :  { %107 = dma.hbm_to_vmem [thread:$0]  %s100_s23, 2048, %s102_s24, [#allocation12], %s2396_s10, %s2396_s10, %s2397_s11  }
  0x19   :  { %2378 = dma.done.wait [#allocation3], 128  }
  0x1a   :  { %2379 = vsyncadd [#allocation3], 4294967168 }
  0x1b   :  { %2380 = dma.done.wait [#allocation6], 544  }
  0x1c   :  { %2381 = vsyncadd [#allocation6], 4294966752 }
  0x1d   :  { %2382 = dma.done.wait [#allocation9], 8256  }
  0x1e   :  { %2383 = vsyncadd [#allocation9], 4294959040 }
  0x1f   :  { %2384 = dma.done.wait [#allocation12], 10240  }
  0x20   :  { %2385 = vsyncadd [#allocation12], 4294957056  ;;  %v1438_v0 = vld [vmem:[#allocation5 + $0x10] sm:$0xf]  ;;  %v2026_v1 = vld [vmem:[#allocation5 + $0x14] sm:$0xf0] }
  0x21   :  { %v2025_v2 = vld [vmem:[#allocation5 + $0x14] sm:$0xf]  ;;  %v1439_v3 = vor.u32 %v2026_v1, %v1438_v0  ;;  %v1440_v4 = vld [vmem:[#allocation5 + $0x18] sm:$0xf0]  ;;  %v1430_v5 = vld [vmem:[#allocation5] sm:$0xf] }
  0x22   :  { %v2024_v6 = vld [vmem:[#allocation5 + $0x4] sm:$0xf0]  ;;  %v1443_v7 = vor.u32 %v2025_v2, %v1440_v4  ;;  %v2023_v8 = vld [vmem:[#allocation5 + $0x4] sm:$0xf]  ;;  %v1432_v9 = vld [vmem:[#allocation5 + $0x8] sm:$0xf0] }
  0x23   :  { %vm176_vm0 = vcmask 261120   ;;  %186 = vmatpush.bf16.msra.mxu0 %v1439_v3  ;;  %v1431_v10 = vor.u32 %v2024_v6, %v1430_v5  ;;  %v1560_v11 = vld [vmem:[#allocation8 + $0xe0] sm:$0xf]  ;;  %v2057_v12 = vld [vmem:[#allocation8 + $0xec] sm:$0xf0]  ;;  %v1435_v14 = vor.u32 %v2023_v8, %v1432_v9  ;;  %v2022_v15 = vld [vmem:[#allocation2] sm:$0xff] }
  0x24   :  { %v1688_v13 = vld [vmem:[#allocation8 + $0x1e0] sm:$0xf]  ;;  %200 = vmatpush.bf16.msra.mxu1 %v1443_v7  ;;  %v1561_v16 = vor.u32 %v2057_v12, %v1560_v11  ;;  %v2089_v17 = vld [vmem:[#allocation8 + $0x1ec] sm:$0xf0]  ;;  %v2055_v18 = vld [vmem:[#allocation8 + $0xe4] sm:$0xf] }
  0x25   :  { %v1562_v19 = vld [vmem:[#allocation8 + $0xf0] sm:$0xf0]  ;;  %v1689_v20 = vor.u32 %v2089_v17, %v1688_v13  ;;  %v2087_v22 = vld [vmem:[#allocation8 + $0x1e4] sm:$0xf]  ;;  %v1544_v24 = vld [vmem:[#allocation8 + $0xc0] sm:$0xf] }
  0x26   :  { %v1565_v21 = vor.u32 %v2055_v18, %v1562_v19  ;;  %v1690_v23 = vld [vmem:[#allocation8 + $0x1f0] sm:$0xf0]  ;;  %608 = vmatpush.bf16.msra.mxu2 %v1561_v16  ;;  %v2053_v26 = vld [vmem:[#allocation8 + $0xcc] sm:$0xf0]  ;;  %v1672_v27 = vld [vmem:[#allocation8 + $0x1c0] sm:$0xf] }
  0x27   :  { %v1693_v25 = vor.u32 %v2087_v22, %v1690_v23  ;;  %v2085_v28 = vld [vmem:[#allocation8 + $0x1cc] sm:$0xf0]  ;;  %187 = vmatpush.bf16.msra.mxu0 %v1431_v10  ;;  %622 = vmatpush.bf16.msra.mxu3 %v1689_v20  ;;  %v1545_v29 = vor.u32 %v2053_v26, %v1544_v24  ;;  %v2051_v31 = vld [vmem:[#allocation8 + $0xc4] sm:$0xf]  ;;  %v1546_v32 = vld [vmem:[#allocation8 + $0xd0] sm:$0xf0] }
  0x28   :  { %v1673_v30 = vor.u32 %v2085_v28, %v1672_v27  ;;  %v2083_v33 = vld [vmem:[#allocation8 + $0x1c4] sm:$0xf]  ;;  %201 = vmatpush.bf16.msra.mxu1 %v1435_v14  ;;  %v1549_v34 = vor.u32 %v2051_v31, %v1546_v32  ;;  %v1674_v35 = vld [vmem:[#allocation8 + $0x1d0] sm:$0xf0]  ;;  %v1528_v36 = vld [vmem:[#allocation8 + $0xa0] sm:$0xf] }
  0x29   :  { %v2049_v37 = vld [vmem:[#allocation8 + $0xac] sm:$0xf0]  ;;  %v1677_v38 = vor.u32 %v2083_v33, %v1674_v35  ;;  %v1656_v39 = vld [vmem:[#allocation8 + $0x1a0] sm:$0xf]  ;;  %v2047_v41 = vld [vmem:[#allocation8 + $0xa4] sm:$0xf] }
  0x2a   :  { %v2081_v40 = vld [vmem:[#allocation8 + $0x1ac] sm:$0xf0]  ;;  %1444 = vmatmul.msk.bf16.vlgmr.msra.gmra.mxu0 %vm176_vm0, %v2022_v15  ;;  %609 = vmatpush.bf16.msra.mxu2 %v1545_v29  ;;  %v1529_v42 = vor.u32 %v2049_v37, %v1528_v36  ;;  %v1530_v43 = vld [vmem:[#allocation8 + $0xb0] sm:$0xf0]  ;;  %v2079_v44 = vld [vmem:[#allocation8 + $0x1a4] sm:$0xf] }
  0x2b   :  { %636 = vmatpush.bf16.msrb.mxu0 %v1565_v21  ;;  %v1658_v45 = vld [vmem:[#allocation8 + $0x1b0] sm:$0xf0]  ;;  %1445 = vmatmul.msk.bf16.vlgmr.msra.gmra.mxu1 %vm176_vm0, %v2022_v15  ;;  %v1657_v46 = vor.u32 %v2081_v40, %v1656_v39  ;;  %v1512_v47 = vld [vmem:[#allocation8 + $0x80] sm:$0xf]  ;;  %v2045_v48 = vld [vmem:[#allocation8 + $0x8c] sm:$0xf0]  ;;  %v1533_v49 = vor.u32 %v2047_v41, %v1530_v43 }
  0x2c   :  { %650 = vmatpush.bf16.msrb.mxu1 %v1693_v25  ;;  %623 = vmatpush.bf16.msra.mxu3 %v1673_v30  ;;  %v1640_v50 = vld [vmem:[#allocation8 + $0x180] sm:$0xf]  ;;  %v2077_v51 = vld [vmem:[#allocation8 + $0x18c] sm:$0xf0]  ;;  %v1661_v52 = vor.u32 %v2079_v44, %v1658_v45  ;;  %v2043_v53 = vld [vmem:[#allocation8 + $0x84] sm:$0xf]  ;;  %v1513_v55 = vor.u32 %v2045_v48, %v1512_v47 }
  0x2d   :  { %v1514_v54 = vld [vmem:[#allocation8 + $0x90] sm:$0xf0]  ;;  %v2075_v56 = vld [vmem:[#allocation8 + $0x184] sm:$0xf]  ;;  %v1641_v58 = vor.u32 %v2077_v51, %v1640_v50  ;;  %v1496_v59 = vld [vmem:[#allocation8 + $0x60] sm:$0xf] }
  0x2e   :  { %610 = vmatpush.bf16.msra.mxu2 %v1529_v42  ;;  %v1642_v57 = vld [vmem:[#allocation8 + $0x190] sm:$0xf0]  ;;  %v2041_v60 = vld [vmem:[#allocation8 + $0x6c] sm:$0xf0]  ;;  %v1517_v61 = vor.u32 %v2043_v53, %v1514_v54  ;;  %v1624_v62 = vld [vmem:[#allocation8 + $0x160] sm:$0xf] }
  0x2f   :  { %637 = vmatpush.bf16.msrb.mxu0 %v1549_v34  ;;  %v2073_v63 = vld [vmem:[#allocation8 + $0x16c] sm:$0xf0]  ;;  %v1645_v0 = vor.u32 %v2075_v56, %v1642_v57  ;;  %v2039_v1 = vld [vmem:[#allocation8 + $0x64] sm:$0xf]  ;;  %v1498_v2 = vld [vmem:[#allocation8 + $0x70] sm:$0xf0]  ;;  %v1497_v3 = vor.u32 %v2041_v60, %v1496_v59 }
  0x30   :  { %651 = vmatpush.bf16.msrb.mxu1 %v1677_v38  ;;  %624 = vmatpush.bf16.msra.mxu3 %v1657_v46  ;;  %v2071_v4 = vld [vmem:[#allocation8 + $0x164] sm:$0xf]  ;;  %v1626_v5 = vld [vmem:[#allocation8 + $0x170] sm:$0xf0]  ;;  %v1625_v6 = vor.u32 %v2073_v63, %v1624_v62  ;;  %v1480_v7 = vld [vmem:[#allocation8 + $0x40] sm:$0xf]  ;;  %v1501_v9 = vor.u32 %v2039_v1, %v1498_v2 }
  0x31   :  { %v2037_v8 = vld [vmem:[#allocation8 + $0x4c] sm:$0xf0]  ;;  %v1608_v10 = vld [vmem:[#allocation8 + $0x140] sm:$0xf]  ;;  %v1629_v12 = vor.u32 %v2071_v4, %v1626_v5  ;;  %v2035_v13 = vld [vmem:[#allocation8 + $0x44] sm:$0xf] }
  0x32   :  { %611 = vmatpush.bf16.msra.mxu2 %v1513_v55  ;;  %v2069_v11 = vld [vmem:[#allocation8 + $0x14c] sm:$0xf0]  ;;  %v1482_v14 = vld [vmem:[#allocation8 + $0x50] sm:$0xf0]  ;;  %v1481_v15 = vor.u32 %v2037_v8, %v1480_v7  ;;  %v2067_v16 = vld [vmem:[#allocation8 + $0x144] sm:$0xf] }
  0x33   :  { %638 = vmatpush.bf16.msrb.mxu0 %v1533_v49  ;;  %v1610_v17 = vld [vmem:[#allocation8 + $0x150] sm:$0xf0]  ;;  %v1609_v18 = vor.u32 %v2069_v11, %v1608_v10  ;;  %v1464_v19 = vld [vmem:[#allocation8 + $0x20] sm:$0xf]  ;;  %v2033_v20 = vld [vmem:[#allocation8 + $0x2c] sm:$0xf0]  ;;  %v1485_v21 = vor.u32 %v2035_v13, %v1482_v14 }
  0x34   :  { %652 = vmatpush.bf16.msrb.mxu1 %v1661_v52  ;;  %625 = vmatpush.bf16.msra.mxu3 %v1641_v58  ;;  %v1592_v22 = vld [vmem:[#allocation8 + $0x120] sm:$0xf]  ;;  %v2065_v23 = vld [vmem:[#allocation8 + $0x12c] sm:$0xf0]  ;;  %v1613_v24 = vor.u32 %v2067_v16, %v1610_v17  ;;  %v2031_v25 = vld [vmem:[#allocation8 + $0x24] sm:$0xf]  ;;  %v1465_v27 = vor.u32 %v2033_v20, %v1464_v19 }
  0x35   :  { %v1466_v26 = vld [vmem:[#allocation8 + $0x30] sm:$0xf0]  ;;  %v2063_v28 = vld [vmem:[#allocation8 + $0x124] sm:$0xf]  ;;  %v1593_v30 = vor.u32 %v2065_v23, %v1592_v22  ;;  %v1448_v31 = vld [vmem:[#allocation8] sm:$0xf] }
  0x36   :  { %612 = vmatpush.bf16.msra.mxu2 %v1497_v3  ;;  %v1594_v29 = vld [vmem:[#allocation8 + $0x130] sm:$0xf0]  ;;  %v2029_v32 = vld [vmem:[#allocation8 + $0xc] sm:$0xf0]  ;;  %v1469_v33 = vor.u32 %v2031_v25, %v1466_v26  ;;  %v1576_v34 = vld [vmem:[#allocation8 + $0x100] sm:$0xf] }
  0x37   :  { %639 = vmatpush.bf16.msrb.mxu0 %v1517_v61  ;;  %v2061_v35 = vld [vmem:[#allocation8 + $0x10c] sm:$0xf0]  ;;  %v1597_v36 = vor.u32 %v2063_v28, %v1594_v29  ;;  %v2027_v37 = vld [vmem:[#allocation8 + $0x4] sm:$0xf]  ;;  %v1450_v38 = vld [vmem:[#allocation8 + $0x10] sm:$0xf0]  ;;  %v1449_v39 = vor.u32 %v2029_v32, %v1448_v31 }
  0x38   :  { %653 = vmatpush.bf16.msrb.mxu1 %v1645_v0  ;;  %626 = vmatpush.bf16.msra.mxu3 %v1625_v6  ;;  %v2059_v40 = vld [vmem:[#allocation8 + $0x104] sm:$0xf]  ;;  %v1578_v41 = vld [vmem:[#allocation8 + $0x110] sm:$0xf0]  ;;  %v1577_v42 = vor.u32 %v2061_v35, %v1576_v34  ;;  %v1453_v43 = vor.u32 %v2027_v37, %v1450_v38  ;;  %v1568_v45 = vld [vmem:[#allocation8 + $0xe8] sm:$0xf] }
  0x39   :  { %v1581_v44 = vor.u32 %v2059_v40, %v1578_v41  ;;  %v2058_v46 = vld [vmem:[#allocation8 + $0xf4] sm:$0xf0]  ;;  %v1696_v47 = vld [vmem:[#allocation8 + $0x1e8] sm:$0xf]  ;;  %v2056_v50 = vld [vmem:[#allocation8 + $0xec] sm:$0xf] }
  0x3a   :  { %613 = vmatpush.bf16.msra.mxu2 %v1481_v15  ;;  %v1569_v48 = vor.u32 %v2058_v46, %v1568_v45  ;;  %v2090_v49 = vld [vmem:[#allocation8 + $0x1f4] sm:$0xf0]  ;;  %v1570_v51 = vld [vmem:[#allocation8 + $0xf8] sm:$0xf0]  ;;  %v2088_v54 = vld [vmem:[#allocation8 + $0x1ec] sm:$0xf] }
  0x3b   :  { %640 = vmatpush.bf16.msrb.mxu0 %v1501_v9  ;;  %v1697_v52 = vor.u32 %v2090_v49, %v1696_v47  ;;  %v1573_v53 = vor.u32 %v2056_v50, %v1570_v51  ;;  %v1698_v55 = vld [vmem:[#allocation8 + $0x1f8] sm:$0xf0]  ;;  %v1552_v57 = vld [vmem:[#allocation8 + $0xc8] sm:$0xf]  ;;  %v2054_v58 = vld [vmem:[#allocation8 + $0xd4] sm:$0xf0] }
  0x3c   :  { %654 = vmatpush.bf16.msrb.mxu1 %v1629_v12  ;;  %627 = vmatpush.bf16.msra.mxu3 %v1609_v18  ;;  %v1701_v56 = vor.u32 %v2088_v54, %v1698_v55  ;;  %v1553_v59 = vor.u32 %v2054_v58, %v1552_v57  ;;  %v1680_v60 = vld [vmem:[#allocation8 + $0x1c8] sm:$0xf]  ;;  %v2086_v61 = vld [vmem:[#allocation8 + $0x1d4] sm:$0xf0]  ;;  %v2052_v62 = vld [vmem:[#allocation8 + $0xcc] sm:$0xf] }
  0x3d   :  { %v1681_v63 = vor.u32 %v2086_v61, %v1680_v60  ;;  %v1554_v0 = vld [vmem:[#allocation8 + $0xd8] sm:$0xf0]  ;;  %v2084_v1 = vld [vmem:[#allocation8 + $0x1cc] sm:$0xf]  ;;  %v1536_v5 = vld [vmem:[#allocation8 + $0xa8] sm:$0xf] }
  0x3e   :  { %614 = vmatpush.bf16.msra.mxu2 %v1465_v27  ;;  %v1682_v2 = vld [vmem:[#allocation8 + $0x1d8] sm:$0xf0]  ;;  %v1557_v3 = vor.u32 %v2052_v62, %v1554_v0  ;;  %v2050_v6 = vld [vmem:[#allocation8 + $0xb4] sm:$0xf0]  ;;  %v1664_v7 = vld [vmem:[#allocation8 + $0x1a8] sm:$0xf] }
  0x3f   :  { %641 = vmatpush.bf16.msrb.mxu0 %v1485_v21  ;;  %v1685_v4 = vor.u32 %v2084_v1, %v1682_v2  ;;  %v1537_v8 = vor.u32 %v2050_v6, %v1536_v5  ;;  %v2082_v9 = vld [vmem:[#allocation8 + $0x1b4] sm:$0xf0]  ;;  %v2048_v10 = vld [vmem:[#allocation8 + $0xac] sm:$0xf]  ;;  %v1538_v11 = vld [vmem:[#allocation8 + $0xb8] sm:$0xf0] }
  0x40   :  { %655 = vmatpush.bf16.msrb.mxu1 %v1613_v24  ;;  %628 = vmatpush.bf16.msra.mxu3 %v1593_v30  ;;  %v1665_v12 = vor.u32 %v2082_v9, %v1664_v7  ;;  %v1541_v13 = vor.u32 %v2048_v10, %v1538_v11  ;;  %v2080_v14 = vld [vmem:[#allocation8 + $0x1ac] sm:$0xf]  ;;  %v1666_v15 = vld [vmem:[#allocation8 + $0x1b8] sm:$0xf0]  ;;  %v1520_v17 = vld [vmem:[#allocation8 + $0x88] sm:$0xf] }
  0x41   :  { %v1669_v16 = vor.u32 %v2080_v14, %v1666_v15  ;;  %v2046_v18 = vld [vmem:[#allocation8 + $0x94] sm:$0xf0]  ;;  %v1648_v19 = vld [vmem:[#allocation8 + $0x188] sm:$0xf]  ;;  %v2044_v22 = vld [vmem:[#allocation8 + $0x8c] sm:$0xf] }
  0x42   :  { %615 = vmatpush.bf16.msra.mxu2 %v1449_v39  ;;  %v1521_v20 = vor.u32 %v2046_v18, %v1520_v17  ;;  %v2078_v21 = vld [vmem:[#allocation8 + $0x194] sm:$0xf0]  ;;  %v1522_v23 = vld [vmem:[#allocation8 + $0x98] sm:$0xf0]  ;;  %v2076_v26 = vld [vmem:[#allocation8 + $0x18c] sm:$0xf] }
  0x43   :  { %642 = vmatpush.bf16.msrb.mxu0 %v1469_v33  ;;  %v1649_v24 = vor.u32 %v2078_v21, %v1648_v19  ;;  %v1525_v25 = vor.u32 %v2044_v22, %v1522_v23  ;;  %v1650_v27 = vld [vmem:[#allocation8 + $0x198] sm:$0xf0]  ;;  %v1504_v29 = vld [vmem:[#allocation8 + $0x68] sm:$0xf]  ;;  %v2042_v30 = vld [vmem:[#allocation8 + $0x74] sm:$0xf0] }
  0x44   :  { %656 = vmatpush.bf16.msrb.mxu1 %v1597_v36  ;;  %629 = vmatpush.bf16.msra.mxu3 %v1577_v42  ;;  %v1653_v28 = vor.u32 %v2076_v26, %v1650_v27  ;;  %v1632_v31 = vld [vmem:[#allocation8 + $0x168] sm:$0xf]  ;;  %v1505_v32 = vor.u32 %v2042_v30, %v1504_v29  ;;  %v2074_v33 = vld [vmem:[#allocation8 + $0x174] sm:$0xf0]  ;;  %v2040_v34 = vld [vmem:[#allocation8 + $0x6c] sm:$0xf] }
  0x45   :  { %v1506_v35 = vld [vmem:[#allocation8 + $0x78] sm:$0xf0]  ;;  %v1633_v36 = vor.u32 %v2074_v33, %v1632_v31  ;;  %v2072_v38 = vld [vmem:[#allocation8 + $0x16c] sm:$0xf]  ;;  %v1488_v40 = vld [vmem:[#allocation8 + $0x48] sm:$0xf] }
  0x46   :  { %664 = vmatpush.bf16.msrb.mxu2 %v1569_v48  ;;  %v1509_v37 = vor.u32 %v2040_v34, %v1506_v35  ;;  %v1634_v39 = vld [vmem:[#allocation8 + $0x178] sm:$0xf0]  ;;  %v2038_v42 = vld [vmem:[#allocation8 + $0x54] sm:$0xf0]  ;;  %v2036_v47 = vld [vmem:[#allocation8 + $0x4c] sm:$0xf] }
  0x47   :  { %643 = vmatpush.bf16.msrb.mxu0 %v1453_v43  ;;  %v1637_v41 = vor.u32 %v2072_v38, %v1634_v39  ;;  %v1616_v43 = vld [vmem:[#allocation8 + $0x148] sm:$0xf]  ;;  %v1489_v45 = vor.u32 %v2038_v42, %v1488_v40  ;;  %v1490_v48 = vld [vmem:[#allocation8 + $0x58] sm:$0xf0]  ;;  %v2068_v49 = vld [vmem:[#allocation8 + $0x14c] sm:$0xf] }
  0x48   :  { %657 = vmatpush.bf16.msrb.mxu1 %v1581_v44  ;;  %678 = vmatpush.bf16.msrb.mxu3 %v1697_v52  ;;  %v2070_v44 = vld [vmem:[#allocation8 + $0x154] sm:$0xf0]  ;;  %v1493_v50 = vor.u32 %v2036_v47, %v1490_v48  ;;  %v1618_v51 = vld [vmem:[#allocation8 + $0x158] sm:$0xf0]  ;;  %v1472_v52 = vld [vmem:[#allocation8 + $0x28] sm:$0xf] }
  0x49   :  { %v1617_v46 = vor.u32 %v2070_v44, %v1616_v43  ;;  %v1621_v54 = vor.u32 %v2068_v49, %v1618_v51  ;;  %v1600_v55 = vld [vmem:[#allocation8 + $0x128] sm:$0xf]  ;;  %v2032_v57 = vld [vmem:[#allocation8 + $0x2c] sm:$0xf]  ;;  %v1602_v61 = vld [vmem:[#allocation8 + $0x138] sm:$0xf0] }
  0x4a   :  { %665 = vmatpush.bf16.msrb.mxu2 %v1553_v59  ;;  %v1474_v59 = vld [vmem:[#allocation8 + $0x38] sm:$0xf0]  ;;  %v2064_v60 = vld [vmem:[#allocation8 + $0x12c] sm:$0xf]  ;;  %v2030_v0 = vld [vmem:[#allocation8 + $0x14] sm:$0xf0] }
  0x4b   :  { %692 = vmatpush.bf16.msra.mxu0 %v1573_v53  ;;  %v2034_v53 = vld [vmem:[#allocation8 + $0x34] sm:$0xf0]  ;;  %v1477_v1 = vor.u32 %v2032_v57, %v1474_v59  ;;  %v1605_v2 = vor.u32 %v2064_v60, %v1602_v61  ;;  %v2028_v5 = vld [vmem:[#allocation8 + $0xc] sm:$0xf]  ;;  %v1458_v6 = vld [vmem:[#allocation8 + $0x18] sm:$0xf0] }
  0x4c   :  { %706 = vmatpush.bf16.msra.mxu1 %v1701_v56  ;;  %679 = vmatpush.bf16.msrb.mxu3 %v1681_v63  ;;  %v2066_v56 = vld [vmem:[#allocation8 + $0x134] sm:$0xf0]  ;;  %v1473_v58 = vor.u32 %v2034_v53, %v1472_v52  ;;  %v1456_v63 = vld [vmem:[#allocation8 + $0x8] sm:$0xf]  ;;  %v2060_v7 = vld [vmem:[#allocation8 + $0x10c] sm:$0xf]  ;;  %v1461_v11 = vor.u32 %v2028_v5, %v1458_v6 }
  0x4d   :  { %v1601_v62 = vor.u32 %v2066_v56, %v1600_v55  ;;  %v1457_v9 = vor.u32 %v2030_v0, %v1456_v63  ;;  %v1824_v23 = vld [vmem:[#allocation11 + $0xf0] sm:$0xf]  ;;  %v2106_v27 = vld [vmem:[#allocation11 + $0x74] sm:$0xf0]  ;;  %v1816_v38 = vld [vmem:[#allocation11 + $0xe0] sm:$0xf] }
  0x4e   :  { %666 = vmatpush.bf16.msrb.mxu2 %v1537_v8  ;;  %v1586_v8 = vld [vmem:[#allocation8 + $0x118] sm:$0xf0]  ;;  %v2120_v39 = vld [vmem:[#allocation11 + $0xe4] sm:$0xf0]  ;;  %v1752_v42 = vld [vmem:[#allocation11 + $0x60] sm:$0xf] }
  0x4f   :  { %693 = vmatpush.bf16.msra.mxu0 %v1557_v3  ;;  %v1584_v3 = vld [vmem:[#allocation8 + $0x108] sm:$0xf]  ;;  %v2154_v29 = vld [vmem:[#allocation11 + $0x1f4] sm:$0xf0]  ;;  %v2104_v43 = vld [vmem:[#allocation11 + $0x64] sm:$0xf0] }
  0x50   :  { %707 = vmatpush.bf16.msra.mxu1 %v1685_v4  ;;  %680 = vmatpush.bf16.msrb.mxu3 %v1665_v12  ;;  %v2062_v4 = vld [vmem:[#allocation8 + $0x114] sm:$0xf0]  ;;  %v1589_v12 = vor.u32 %v2060_v7, %v1586_v8  ;;  %v2138_v33 = vld [vmem:[#allocation11 + $0x174] sm:$0xf0]  ;;  %v2152_v47 = vld [vmem:[#allocation11 + $0x1e4] sm:$0xf0]  ;;  %v1753_v52 = vor.u32 %v2104_v43, %v1752_v42 }
  0x51   :  { %v1585_v10 = vor.u32 %v2062_v4, %v1584_v3  ;;  %v1880_v48 = vld [vmem:[#allocation11 + $0x160] sm:$0xf]  ;;  %v2136_v49 = vld [vmem:[#allocation11 + $0x164] sm:$0xf0]  ;;  %v1808_v51 = vld [vmem:[#allocation11 + $0xd0] sm:$0xf] }
  0x52   :  { %667 = vmatpush.bf16.msrb.mxu2 %v1521_v20  ;;  %v2118_v53 = vld [vmem:[#allocation11 + $0xd4] sm:$0xf0]  ;;  %v1881_v57 = vor.u32 %v2136_v49, %v1880_v48  ;;  %v1800_v61 = vld [vmem:[#allocation11 + $0xc0] sm:$0xf]  ;;  %v2116_v63 = vld [vmem:[#allocation11 + $0xc4] sm:$0xf0] }
  0x53   :  { %694 = vmatpush.bf16.msra.mxu0 %v1541_v13  ;;  %v145_v13 = vld [vmem:[#allocation7] sm:$0x3]  ;;  %v1809_v60 = vor.u32 %v2118_v53, %v1808_v51  ;;  %v1736_v0 = vld [vmem:[#allocation11 + $0x40] sm:$0xf]  ;;  %v1801_v3 = vor.u32 %v2116_v63, %v1800_v61  ;;  %v1792_v4 = vld [vmem:[#allocation11 + $0xb0] sm:$0xf] }
  0x54   :  { %708 = vmatpush.bf16.msra.mxu1 %v1669_v16  ;;  %681 = vmatpush.bf16.msrb.mxu3 %v1649_v24  ;;  %v147_v16 = vperm.slane %v145_v13, 0  ;;  %v148_v17 = vperm.slane %v145_v13, 1  ;;  %v2122_v24 = vld [vmem:[#allocation11 + $0xf4] sm:$0xf0]  ;;  %v1728_v7 = vld [vmem:[#allocation11 + $0x30] sm:$0xf] }
  0x55   :  { %v2102_v55 = vld [vmem:[#allocation11 + $0x54] sm:$0xf0]  ;;  %v1720_v13 = vld [vmem:[#allocation11 + $0x20] sm:$0xf]  ;;  %v2092_v42 = vld [vmem:[#allocation11 + $0x4] sm:$0xf0] }
  0x56   :  { %668 = vmatpush.bf16.msrb.mxu2 %v1505_v32  ;;  %v1888_v32 = vld [vmem:[#allocation11 + $0x170] sm:$0xf]  ;;  %v2150_v59 = vld [vmem:[#allocation11 + $0x1d4] sm:$0xf0]  ;;  %v1762_v48 = vld [vmem:[#allocation11 + $0x78] sm:$0xf0] }
  0x57   :  { %695 = vmatpush.bf16.msra.mxu0 %v1525_v25  ;;  %v1760_v25 = vld [vmem:[#allocation11 + $0x70] sm:$0xf]  ;;  %v2114_v6 = vld [vmem:[#allocation11 + $0xb4] sm:$0xf0]  ;;  %v1912_v49 = vld [vmem:[#allocation11 + $0x1a0] sm:$0xf] }
  0x58   :  { %709 = vmatpush.bf16.msra.mxu1 %v1653_v28  ;;  %682 = vmatpush.bf16.msrb.mxu3 %v1633_v36  ;;  %v1952_v28 = vld [vmem:[#allocation11 + $0x1f0] sm:$0xf]  ;;  %v1761_v40 = vor.u32 %v2106_v27, %v1760_v25  ;;  %v2098_v8 = vld [vmem:[#allocation11 + $0x34] sm:$0xf0]  ;;  %v2121_v25 = vld [vmem:[#allocation11 + $0xf4] sm:$0xf] }
  0x59   :  { %v1953_v44 = vor.u32 %v2154_v29, %v1952_v28  ;;  %v1712_v29 = vld [vmem:[#allocation11 + $0x10] sm:$0xf]  ;;  %v2117_v53 = vld [vmem:[#allocation11 + $0xd4] sm:$0xf]  ;;  %v2142_v63 = vld [vmem:[#allocation11 + $0x194] sm:$0xf0] }
  0x5a   :  { %669 = vmatpush.bf16.msrb.mxu2 %v1489_v45  ;;  %v1944_v45 = vld [vmem:[#allocation11 + $0x1e0] sm:$0xf]  ;;  %s2401_s3 = smov [#allocation14]   ;;  %s1408_s29 = sshll.u32 %s2508_s9, 4  ;;  %s1409_s29 = int_to_ptr.hbm [resolvable:$true] %s1408_s29 }
  0x5b   :  { %696 = vmatpush.bf16.msra.mxu0 %v1509_v37  ;;  %v1825_v37 = vor.u32 %v2122_v24, %v1824_v23  ;;  %v1945_v56 = vor.u32 %v2152_v47, %v1944_v45  ;;  %v2148_v24 = vld [vmem:[#allocation11 + $0x1c4] sm:$0xf0]  ;;  %s1406_s26 = sshll.u32 %s2401_s3, 4  ;;  %s1407_s26 = int_to_ptr.vmem [resolvable:$true] %s1406_s26 }
  0x5c   :  { %710 = vmatpush.bf16.msra.mxu1 %v1637_v41  ;;  %683 = vmatpush.bf16.msrb.mxu3 %v1617_v46  ;;  %v1889_v46 = vor.u32 %v2138_v33, %v1888_v32  ;;  %v2134_v33 = vld [vmem:[#allocation11 + $0x154] sm:$0xf0]  ;;  %v2132_v45 = vld [vmem:[#allocation11 + $0x144] sm:$0xf0] }
  0x5e   :  { %670 = vmatpush.bf16.msrb.mxu2 %v1473_v58  ;;  %v1936_v58 = vld [vmem:[#allocation11 + $0x1d0] sm:$0xf] }
  0x5f   :  { %697 = vmatpush.bf16.msra.mxu0 %v1493_v50  ;;  %v1817_v50 = vor.u32 %v2120_v39, %v1816_v38  ;;  %v2119_v38 = vld [vmem:[#allocation11 + $0xe4] sm:$0xf]  ;;  %v1818_v39 = vld [vmem:[#allocation11 + $0xe8] sm:$0xf0] }
  0x60   :  { %711 = vmatpush.bf16.msra.mxu1 %v1621_v54  ;;  %684 = vmatpush.bf16.msrb.mxu3 %v1601_v62  ;;  %v1744_v54 = vld [vmem:[#allocation11 + $0x50] sm:$0xf] }
  0x61   :  { %v1745_v62 = vor.u32 %v2102_v55, %v1744_v54  ;;  %v1810_v54 = vld [vmem:[#allocation11 + $0xd8] sm:$0xf0] }
  0x62   :  { %671 = vmatpush.bf16.msrb.mxu2 %v1457_v9  ;;  %v1793_v9 = vor.u32 %v2114_v6, %v1792_v4  ;;  %v1813_v55 = vor.u32 %v2117_v53, %v1810_v54  ;;  %v1848_v4 = vld [vmem:[#allocation11 + $0x120] sm:$0xf]  ;;  %v1770_v53 = vld [vmem:[#allocation11 + $0x88] sm:$0xf0]  ;;  %v2147_v54 = vld [vmem:[#allocation11 + $0x1c4] sm:$0xf] }
  0x63   :  { %698 = vmatpush.bf16.msra.mxu0 %v1477_v1  ;;  %v2100_v1 = vld [vmem:[#allocation11 + $0x44] sm:$0xf0] }
  0x64   :  { %712 = vmatpush.bf16.msra.mxu1 %v1605_v2  ;;  %685 = vmatpush.bf16.msrb.mxu3 %v1585_v10  ;;  %v1937_v2 = vor.u32 %v2150_v59, %v1936_v58  ;;  %v1737_v5 = vor.u32 %v2100_v1, %v1736_v0  ;;  %v1784_v10 = vld [vmem:[#allocation11 + $0xa0] sm:$0xf]  ;;  %v2103_v59 = vld [vmem:[#allocation11 + $0x64] sm:$0xf] }
  0x65   :  { %v2115_v1 = vld [vmem:[#allocation11 + $0xc4] sm:$0xf] }
  0x67   :  { %699 = vmatpush.bf16.msra.mxu0 %v1461_v11  ;;  %v1729_v11 = vor.u32 %v2098_v8, %v1728_v7  ;;  %v2101_v7 = vld [vmem:[#allocation11 + $0x54] sm:$0xf]  ;;  %v1746_v8 = vld [vmem:[#allocation11 + $0x58] sm:$0xf0] }
  0x68   :  { %713 = vmatpush.bf16.msra.mxu1 %v1589_v12  ;;  %v2112_v12 = vld [vmem:[#allocation11 + $0xa4] sm:$0xf0] }
  0xa7   :  { %v189_v14 = vpop.f32.mrf.mxu0 }
  0xa8   :  { %v203_v15 = vpop.f32.mrf.mxu1  ;;  %v190_v18 = vadd.f32 %v189_v14, %v147_v16  ;;  %v2096_v14 = vld [vmem:[#allocation11 + $0x24] sm:$0xf0] }
  0xa9   :  { %v204_v19 = vadd.f32 %v203_v15, %v148_v17  ;;  %v1785_v15 = vor.u32 %v2112_v12, %v1784_v10  ;;  %v1896_v10 = vld [vmem:[#allocation11 + $0x180] sm:$0xf] }
  0xaa   :  { %v208_v30 = vmax.f32 %v190_v18, 0.0  ;;  %v2110_v18 = vld [vmem:[#allocation11 + $0x94] sm:$0xf0] }
  0xab   :  { %v209_v34 = vmax.f32 %v204_v19, 0.0 }
  0xaf   :  { %v191_v20 = vpop.f32.mrf.mxu0 }
  0xb0   :  { %v192_v21 = vadd.f32 %v191_v20, %v147_v16  ;;  %v205_v22 = vpop.f32.mrf.mxu1  ;;  %v1721_v16 = vor.u32 %v2096_v14, %v1720_v13  ;;  %v1768_v20 = vld [vmem:[#allocation11 + $0x80] sm:$0xf]  ;;  %v2113_v13 = vld [vmem:[#allocation11 + $0xb4] sm:$0xf]  ;;  %v1794_v14 = vld [vmem:[#allocation11 + $0xb8] sm:$0xf0] }
  0xb1   :  { %v206_v26 = vadd.f32 %v205_v22, %v148_v17  ;;  %v1776_v17 = vld [vmem:[#allocation11 + $0x90] sm:$0xf]  ;;  %v1928_v22 = vld [vmem:[#allocation11 + $0x1c0] sm:$0xf] }
  0xb2   :  { %v210_v31 = vmax.f32 %v192_v21, 0.0  ;;  %v1777_v19 = vor.u32 %v2110_v18, %v1776_v17  ;;  %v2108_v21 = vld [vmem:[#allocation11 + $0x84] sm:$0xf0]  ;;  %v1929_v27 = vor.u32 %v2148_v24, %v1928_v22  ;;  %v1954_v17 = vld [vmem:[#allocation11 + $0x1f8] sm:$0xf0] }
  0xb3   :  { %v211_v35 = vmax.f32 %v206_v26, 0.0  ;;  %v1769_v23 = vor.u32 %v2108_v21, %v1768_v20  ;;  %v1826_v26 = vld [vmem:[#allocation11 + $0xf8] sm:$0xf0]  ;;  %v1840_v18 = vld [vmem:[#allocation11 + $0x110] sm:$0xf] }
  0xb4   :  { %v212_v36 = vpack.c.bf16 %v210_v31, %v208_v30  ;;  %v1829_v28 = vor.u32 %v2121_v25, %v1826_v26  ;;  %v2094_v30 = vld [vmem:[#allocation11 + $0x14] sm:$0xf0]  ;;  %v1872_v31 = vld [vmem:[#allocation11 + $0x150] sm:$0xf]  ;;  %v2099_v21 = vld [vmem:[#allocation11 + $0x44] sm:$0xf] }
  0xb5   :  { %v213_v41 = vpack.c.bf16 %v211_v35, %v209_v34  ;;  %v1713_v32 = vor.u32 %v2094_v30, %v1712_v29  ;;  %v1873_v34 = vor.u32 %v2134_v33, %v1872_v31  ;;  %v1920_v35 = vld [vmem:[#allocation11 + $0x1b0] sm:$0xf]  ;;  %v2126_v20 = vld [vmem:[#allocation11 + $0x114] sm:$0xf0]  ;;  %v1738_v22 = vld [vmem:[#allocation11 + $0x48] sm:$0xf0] }
  0xb6   :  { %616 = vmatmul.bf16.vlgmr.msra.gmra.mxu2 %v212_v36  ;;  %644 = vmatmul.bf16.vlgmr.msrb.gmra.mxu0 %v212_v36  ;;  %v1741_v24 = vor.u32 %v2099_v21, %v1738_v22  ;;  %v2111_v25 = vld [vmem:[#allocation11 + $0xa4] sm:$0xf]  ;;  %v1786_v26 = vld [vmem:[#allocation11 + $0xa8] sm:$0xf0]  ;;  %v1832_v30 = vld [vmem:[#allocation11 + $0x100] sm:$0xf] }
  0xb7   :  { %630 = vmatmul.bf16.vlgmr.msra.gmra.mxu3 %v213_v41  ;;  %658 = vmatmul.bf16.vlgmr.msrb.gmra.mxu1 %v213_v41  ;;  %v1946_v29 = vld [vmem:[#allocation11 + $0x1e8] sm:$0xf0]  ;;  %v2097_v33 = vld [vmem:[#allocation11 + $0x34] sm:$0xf] }
  0xb8   :  { %1136 = vmatpush.bf16.msra.mxu3 %v1825_v37  ;;  %1122 = vmatpush.bf16.msra.mxu2 %v1761_v40  ;;  %v1821_v40 = vor.u32 %v2119_v38, %v1818_v39  ;;  %v1890_v38 = vld [vmem:[#allocation11 + $0x178] sm:$0xf0] }
  0xb9   :  { %1164 = vmatpush.bf16.msrb.mxu1 %v1953_v44  ;;  %1150 = vmatpush.bf16.msrb.mxu0 %v1889_v46  ;;  %v1864_v44 = vld [vmem:[#allocation11 + $0x140] sm:$0xf]  ;;  %v2105_v46 = vld [vmem:[#allocation11 + $0x74] sm:$0xf] }
  0xba   :  { %v1865_v47 = vor.u32 %v2132_v45, %v1864_v44  ;;  %v1765_v51 = vor.u32 %v2105_v46, %v1762_v48  ;;  %v1938_v44 = vld [vmem:[#allocation11 + $0x1d8] sm:$0xf0]  ;;  %v2095_v46 = vld [vmem:[#allocation11 + $0x24] sm:$0xf] }
  0xbb   :  { %v2135_v48 = vld [vmem:[#allocation11 + $0x164] sm:$0xf] }
  0xbc   :  { %1137 = vmatpush.bf16.msra.mxu3 %v1817_v50  ;;  %1123 = vmatpush.bf16.msra.mxu2 %v1753_v52  ;;  %v2144_v50 = vld [vmem:[#allocation11 + $0x1a4] sm:$0xf0] }
  0xbd   :  { %1165 = vmatpush.bf16.msrb.mxu1 %v1945_v56  ;;  %1151 = vmatpush.bf16.msrb.mxu0 %v1881_v57  ;;  %v1913_v52 = vor.u32 %v2144_v50, %v1912_v49  ;;  %v1856_v56 = vld [vmem:[#allocation11 + $0x130] sm:$0xf]  ;;  %v2130_v57 = vld [vmem:[#allocation11 + $0x134] sm:$0xf0]  ;;  %v1882_v50 = vld [vmem:[#allocation11 + $0x168] sm:$0xf0] }
  0xbe   :  { %v1857_v58 = vor.u32 %v2130_v57, %v1856_v56  ;;  %v1930_v57 = vld [vmem:[#allocation11 + $0x1c8] sm:$0xf0] }
  0xc0   :  { %1138 = vmatpush.bf16.msra.mxu3 %v1809_v60  ;;  %1124 = vmatpush.bf16.msra.mxu2 %v1745_v62  ;;  %v1754_v60 = vld [vmem:[#allocation11 + $0x68] sm:$0xf0]  ;;  %v1904_v62 = vld [vmem:[#allocation11 + $0x190] sm:$0xf] }
  0xc1   :  { %1166 = vmatpush.bf16.msrb.mxu1 %v1937_v2  ;;  %1152 = vmatpush.bf16.msrb.mxu0 %v1873_v34  ;;  %v1757_v61 = vor.u32 %v2103_v59, %v1754_v60  ;;  %v1905_v0 = vor.u32 %v2142_v63, %v1904_v62  ;;  %v1802_v2 = vld [vmem:[#allocation11 + $0xc8] sm:$0xf0]  ;;  %v1730_v34 = vld [vmem:[#allocation11 + $0x38] sm:$0xf0]  ;;  %v2093_v59 = vld [vmem:[#allocation11 + $0x14] sm:$0xf] }
  0xc2   :  { %v1714_v60 = vld [vmem:[#allocation11 + $0x18] sm:$0xf0] }
  0xc3   :  { %v1717_v62 = vor.u32 %v2093_v59, %v1714_v60  ;;  %v1874_v63 = vld [vmem:[#allocation11 + $0x158] sm:$0xf0] }
  0xc4   :  { %1139 = vmatpush.bf16.msra.mxu3 %v1801_v3  ;;  %1125 = vmatpush.bf16.msra.mxu2 %v1737_v5  ;;  %v1805_v3 = vor.u32 %v2115_v1, %v1802_v2  ;;  %v2128_v5 = vld [vmem:[#allocation11 + $0x124] sm:$0xf0]  ;;  %v2145_v2 = vld [vmem:[#allocation11 + $0x1b4] sm:$0xf] }
  0xc5   :  { %1167 = vmatpush.bf16.msrb.mxu1 %v1929_v27  ;;  %1153 = vmatpush.bf16.msrb.mxu0 %v1865_v47  ;;  %v1849_v6 = vor.u32 %v2128_v5, %v1848_v4  ;;  %v2151_v27 = vld [vmem:[#allocation11 + $0x1e4] sm:$0xf]  ;;  %v1722_v47 = vld [vmem:[#allocation11 + $0x28] sm:$0xf0] }
  0xc6   :  { %672 = vmatmul.bf16.vlgmr.msrb.gmra.mxu2 %v212_v36  ;;  %700 = vmatmul.bf16.vlgmr.msra.gmra.mxu0 %v212_v36  ;;  %v2146_v36 = vld [vmem:[#allocation11 + $0x1b4] sm:$0xf0]  ;;  %v1949_v31 = vor.u32 %v2151_v27, %v1946_v29  ;;  %v1725_v49 = vor.u32 %v2095_v46, %v1722_v47 }
  0xc7   :  { %686 = vmatmul.bf16.vlgmr.msrb.gmra.mxu3 %v213_v41  ;;  %714 = vmatmul.bf16.vlgmr.msra.gmra.mxu1 %v213_v41  ;;  %v1921_v37 = vor.u32 %v2146_v36, %v1920_v35  ;;  %v1704_v41 = vld [vmem:[#allocation11] sm:$0xf]  ;;  %v1733_v36 = vor.u32 %v2097_v33, %v1730_v34  ;;  %v1898_v33 = vld [vmem:[#allocation11 + $0x188] sm:$0xf0] }
  0xc8   :  { %1140 = vmatpush.bf16.msra.mxu3 %v1793_v9  ;;  %1126 = vmatpush.bf16.msra.mxu2 %v1729_v11  ;;  %v1705_v43 = vor.u32 %v2092_v42, %v1704_v41  ;;  %v1749_v9 = vor.u32 %v2101_v7, %v1746_v8  ;;  %v2140_v11 = vld [vmem:[#allocation11 + $0x184] sm:$0xf0]  ;;  %v1778_v41 = vld [vmem:[#allocation11 + $0x98] sm:$0xf0]  ;;  %v2149_v42 = vld [vmem:[#allocation11 + $0x1d4] sm:$0xf] }
  0xc9   :  { %1168 = vmatpush.bf16.msrb.mxu1 %v1921_v37  ;;  %1154 = vmatpush.bf16.msrb.mxu0 %v1857_v58  ;;  %v1897_v12 = vor.u32 %v2140_v11, %v1896_v10  ;;  %v2137_v37 = vld [vmem:[#allocation11 + $0x174] sm:$0xf]  ;;  %v1941_v45 = vor.u32 %v2149_v42, %v1938_v44  ;;  %v1933_v58 = vor.u32 %v2147_v54, %v1930_v57  ;;  %v2091_v7 = vld [vmem:[#allocation11 + $0x4] sm:$0xf]  ;;  %v1706_v8 = vld [vmem:[#allocation11 + $0x8] sm:$0xf0] }
  0xca   :  { %v1893_v39 = vor.u32 %v2137_v37, %v1890_v38  ;;  %v1709_v10 = vor.u32 %v2091_v7, %v1706_v8  ;;  %v1866_v11 = vld [vmem:[#allocation11 + $0x148] sm:$0xf0]  ;;  %v2125_v37 = vld [vmem:[#allocation11 + $0x114] sm:$0xf]  ;;  %v1842_v38 = vld [vmem:[#allocation11 + $0x118] sm:$0xf0] }
  0xcc   :  { %1141 = vmatpush.bf16.msra.mxu3 %v1785_v15  ;;  %1127 = vmatpush.bf16.msra.mxu2 %v1721_v16  ;;  %v1797_v15 = vor.u32 %v2113_v13, %v1794_v14  ;;  %v2153_v16 = vld [vmem:[#allocation11 + $0x1f4] sm:$0xf]  ;;  %v2143_v13 = vld [vmem:[#allocation11 + $0x1a4] sm:$0xf]  ;;  %v1914_v14 = vld [vmem:[#allocation11 + $0x1a8] sm:$0xf0] }
  0xcd   :  { %1169 = vmatpush.bf16.msrb.mxu1 %v1913_v52  ;;  %1155 = vmatpush.bf16.msrb.mxu0 %v1849_v6  ;;  %v2107_v52 = vld [vmem:[#allocation11 + $0x84] sm:$0xf] }
  0xce   :  { %v1773_v56 = vor.u32 %v2107_v52, %v1770_v53  ;;  %v2123_v52 = vld [vmem:[#allocation11 + $0x104] sm:$0xf]  ;;  %v1834_v53 = vld [vmem:[#allocation11 + $0x108] sm:$0xf0] }
  0xcf   :  { %v1837_v54 = vor.u32 %v2123_v52, %v1834_v53 }
  0xd0   :  { %1142 = vmatpush.bf16.msra.mxu3 %v1777_v19  ;;  %1128 = vmatpush.bf16.msra.mxu2 %v1713_v32  ;;  %v1957_v19 = vor.u32 %v2153_v16, %v1954_v17  ;;  %v2124_v32 = vld [vmem:[#allocation11 + $0x104] sm:$0xf0]  ;;  %v1917_v16 = vor.u32 %v2143_v13, %v1914_v14 }
  0xd1   :  { %1170 = vmatpush.bf16.msrb.mxu1 %v1905_v0  ;;  %v1833_v35 = vor.u32 %v2124_v32, %v1832_v30  ;;  %v2139_v32 = vld [vmem:[#allocation11 + $0x184] sm:$0xf] }
  0xd4   :  { %1143 = vmatpush.bf16.msra.mxu3 %v1769_v23  ;;  %1129 = vmatpush.bf16.msra.mxu2 %v1705_v43  ;;  %v1841_v23 = vor.u32 %v2126_v20, %v1840_v18  ;;  %v1858_v20 = vld [vmem:[#allocation11 + $0x138] sm:$0xf0] }
  0xd5   :  { %1171 = vmatpush.bf16.msrb.mxu1 %v1897_v12 }
  0xd6   :  { %1156 = vmatpush.bf16.msrb.mxu0 %v1841_v23  ;;  %v2141_v23 = vld [vmem:[#allocation11 + $0x194] sm:$0xf] }
  0xd8   :  { %1192 = vmatpush.bf16.msrb.mxu3 %v1829_v28  ;;  %1178 = vmatpush.bf16.msrb.mxu2 %v1765_v51  ;;  %v1789_v28 = vor.u32 %v2111_v25, %v1786_v26  ;;  %v1885_v51 = vor.u32 %v2135_v48, %v1882_v50  ;;  %v2127_v25 = vld [vmem:[#allocation11 + $0x124] sm:$0xf] }
  0xd9   :  { %1220 = vmatpush.bf16.msra.mxu1 %v1957_v19  ;;  %v2129_v19 = vld [vmem:[#allocation11 + $0x134] sm:$0xf] }
  0xda   :  { %1157 = vmatpush.bf16.msrb.mxu0 %v1833_v35  ;;  %v1861_v22 = vor.u32 %v2129_v19, %v1858_v20  ;;  %v2158_v19 = vld [vmem:[#allocation13 + $0x18] sm:$0xff] }
  0xdb   :  { %v2170_v20 = vld [vmem:[#allocation13 + $0x78] sm:$0xff] }
  0xdc   :  { %1193 = vmatpush.bf16.msrb.mxu3 %v1821_v40  ;;  %1179 = vmatpush.bf16.msrb.mxu2 %v1757_v61  ;;  %v2109_v40 = vld [vmem:[#allocation11 + $0x94] sm:$0xf] }
  0xdd   :  { %1221 = vmatpush.bf16.msra.mxu1 %v1949_v31  ;;  %v1781_v43 = vor.u32 %v2109_v40, %v1778_v41  ;;  %v2133_v61 = vld [vmem:[#allocation11 + $0x154] sm:$0xf] }
  0xde   :  { %1206 = vmatpush.bf16.msra.mxu0 %v1893_v39  ;;  %v1877_v1 = vor.u32 %v2133_v61, %v1874_v63  ;;  %v1901_v39 = vor.u32 %v2139_v32, %v1898_v33  ;;  %v2164_v32 = vld [vmem:[#allocation13 + $0x48] sm:$0xff] }
  0xe0   :  { %1194 = vmatpush.bf16.msrb.mxu3 %v1813_v55  ;;  %1180 = vmatpush.bf16.msrb.mxu2 %v1749_v9  ;;  %v2481_v55 = vld [vmem:[#allocation10] sm:$0xf]  ;;  %v2131_v9 = vld [vmem:[#allocation11 + $0x144] sm:$0xf] }
  0xe1   :  { %1222 = vmatpush.bf16.msra.mxu1 %v1941_v45  ;;  %v281_v4 = vperm.slane %v2481_v55, 1  ;;  %v1869_v12 = vor.u32 %v2131_v9, %v1866_v11  ;;  %v280_v17 = vperm.slane %v2481_v55, 0  ;;  %v283_v50 = vperm.slane %v2481_v55, 3 }
  0xe2   :  { %1207 = vmatpush.bf16.msra.mxu0 %v1885_v51  ;;  %v282_v61 = vperm.slane %v2481_v55, 2 }
  0xe4   :  { %1195 = vmatpush.bf16.msrb.mxu3 %v1805_v3  ;;  %1181 = vmatpush.bf16.msrb.mxu2 %v1741_v24  ;;  %v1922_v3 = vld [vmem:[#allocation11 + $0x1b8] sm:$0xf0] }
  0xe5   :  { %1223 = vmatpush.bf16.msra.mxu1 %v1933_v58  ;;  %v1925_v6 = vor.u32 %v2145_v2, %v1922_v3  ;;  %v1906_v24 = vld [vmem:[#allocation11 + $0x198] sm:$0xf0] }
  0xe6   :  { %1208 = vmatpush.bf16.msra.mxu0 %v1877_v1  ;;  %v1909_v27 = vor.u32 %v2141_v23, %v1906_v24  ;;  %v2156_v23 = vld [vmem:[#allocation13 + $0x8] sm:$0xff] }
  0xe7   :  { %v2168_v24 = vld [vmem:[#allocation13 + $0x68] sm:$0xff] }
  0xe8   :  { %1196 = vmatpush.bf16.msrb.mxu3 %v1797_v15  ;;  %1182 = vmatpush.bf16.msrb.mxu2 %v1733_v36 }
  0xe9   :  { %1224 = vmatpush.bf16.msra.mxu1 %v1925_v6 }
  0xea   :  { %1209 = vmatpush.bf16.msra.mxu0 %v1869_v12 }
  0xec   :  { %1197 = vmatpush.bf16.msrb.mxu3 %v1789_v28  ;;  %1183 = vmatpush.bf16.msrb.mxu2 %v1725_v49  ;;  %v1850_v28 = vld [vmem:[#allocation11 + $0x128] sm:$0xf0] }
  0xed   :  { %1225 = vmatpush.bf16.msra.mxu1 %v1917_v16  ;;  %v1853_v34 = vor.u32 %v2127_v25, %v1850_v28  ;;  %v2161_v16 = vld [vmem:[#allocation13 + $0x30] sm:$0xff]  ;;  %v2155_v25 = vld [vmem:[#allocation13] sm:$0xff] }
  0xee   :  { %1210 = vmatpush.bf16.msra.mxu0 %v1861_v22  ;;  %v2169_v22 = vld [vmem:[#allocation13 + $0x70] sm:$0xff] }
  0xef   :  { %v2165_v28 = vld [vmem:[#allocation13 + $0x50] sm:$0xff] }
  0xf0   :  { %1198 = vmatpush.bf16.msrb.mxu3 %v1781_v43  ;;  %1184 = vmatpush.bf16.msrb.mxu2 %v1717_v62  ;;  %v1845_v43 = vor.u32 %v2125_v37, %v1842_v38 }
  0xf1   :  { %1226 = vmatpush.bf16.msra.mxu1 %v1909_v27  ;;  %v2166_v27 = vld [vmem:[#allocation13 + $0x58] sm:$0xff] }
  0xf2   :  { %1211 = vmatpush.bf16.msra.mxu0 %v1853_v34 }
  0xf4   :  { %1199 = vmatpush.bf16.msrb.mxu3 %v1773_v56  ;;  %1185 = vmatpush.bf16.msrb.mxu2 %v1709_v10 }
  0xf5   :  { %1227 = vmatpush.bf16.msra.mxu1 %v1901_v39 }
  0xf6   :  { %1212 = vmatpush.bf16.msra.mxu0 %v1845_v43 }
  0xfa   :  { %1213 = vmatpush.bf16.msra.mxu0 %v1837_v54 }
 0x133   :  { %v645_v0 = vpop.f32.mrf.mxu0 }
 0x134   :  { %v659_v5 = vpop.f32.mrf.mxu1  ;;  %v646_v15 = vadd.f32 %v645_v0, %v281_v4 }
 0x136   :  { %v660_v29 = vadd.f32 %v659_v5, %v646_v15  ;;  %v2162_v15 = vld [vmem:[#allocation13 + $0x38] sm:$0xff] }
 0x138   :  { %v721_v40 = vmax.f32 %v660_v29, 0.0 }
 0x139   :  { %v617_v18 = vpop.f32.mrf.mxu2 }
 0x13a   :  { %v631_v21 = vpop.f32.mrf.mxu3  ;;  %v618_v35 = vadd.f32 %v617_v18, %v280_v17  ;;  %v2159_v18 = vld [vmem:[#allocation13 + $0x20] sm:$0xff] }
 0x13b   :  { %v647_v26 = vpop.f32.mrf.mxu0 }
 0x13c   :  { %v648_v30 = vadd.f32 %v647_v26, %v281_v4  ;;  %v661_v31 = vpop.f32.mrf.mxu1  ;;  %v632_v44 = vadd.f32 %v631_v21, %v618_v35  ;;  %v2157_v21 = vld [vmem:[#allocation13 + $0x10] sm:$0xff]  ;;  %v2167_v26 = vld [vmem:[#allocation13 + $0x60] sm:$0xff] }
 0x13d   :  { %v2163_v35 = vld [vmem:[#allocation13 + $0x40] sm:$0xff] }
 0x13e   :  { %v662_v36 = vadd.f32 %v661_v31, %v648_v30  ;;  %v720_v56 = vmax.f32 %v632_v44, 0.0  ;;  %v796_v31 = vld [vmem:[%s2505_s6] sm:$0x3] }
 0x13f   :  { %v798_v33 = vperm.slane %v796_v31, 0 }
 0x140   :  { %v725_v41 = vmax.f32 %v662_v36, 0.0 }
 0x141   :  { %v619_v42 = vpop.f32.mrf.mxu2 }
 0x142   :  { %v729_v45 = vpack.c.bf16 %v725_v41, %v721_v40  ;;  %v620_v46 = vadd.f32 %v619_v42, %v280_v17  ;;  %v633_v47 = vpop.f32.mrf.mxu3  ;;  %v2160_v17 = vld [vmem:[#allocation13 + $0x28] sm:$0xff] }
 0x143   :  { %v701_v48 = vpop.f32.mrf.mxu0 }
 0x144   :  { %v634_v49 = vadd.f32 %v633_v47, %v620_v46  ;;  %v715_v51 = vpop.f32.mrf.mxu1  ;;  %1144 = vmatmul.bf16.vlgmr.msra.gmra.mxu3 %v729_v45  ;;  %v702_v59 = vadd.f32 %v701_v48, %v283_v50 }
 0x145   :  { %1386 = vmatpush.bf16.msra.mxu3 %v2170_v20 }
 0x146   :  { %v724_v57 = vmax.f32 %v634_v49, 0.0  ;;  %v716_v0 = vadd.f32 %v715_v51, %v702_v59  ;;  %v799_v49 = vperm.slane %v796_v31, 1 }
 0x148   :  { %v728_v58 = vpack.c.bf16 %v724_v57, %v720_v56  ;;  %v723_v5 = vmax.f32 %v716_v0, 0.0 }
 0x149   :  { %v673_v60 = vpop.f32.mrf.mxu2  ;;  %1387 = vmatpush.bf16.msra.mxu3 %v2169_v22 }
 0x14a   :  { %v687_v62 = vpop.f32.mrf.mxu3  ;;  %1130 = vmatmul.bf16.vlgmr.msra.gmra.mxu2 %v728_v58  ;;  %v674_v3 = vadd.f32 %v673_v60, %v282_v61 }
 0x14b   :  { %v703_v63 = vpop.f32.mrf.mxu0  ;;  %1372 = vmatpush.bf16.msra.mxu2 %v2162_v15 }
 0x14c   :  { %v704_v1 = vadd.f32 %v703_v63, %v283_v50  ;;  %v717_v2 = vpop.f32.mrf.mxu1  ;;  %v688_v8 = vadd.f32 %v687_v62, %v674_v3 }
 0x14d   :  { %1388 = vmatpush.bf16.msra.mxu3 %v2168_v24 }
 0x14e   :  { %v718_v4 = vadd.f32 %v717_v2, %v704_v1  ;;  %v722_v13 = vmax.f32 %v688_v8, 0.0 }
 0x14f   :  { %1373 = vmatpush.bf16.msra.mxu2 %v2161_v16 }
 0x150   :  { %v727_v6 = vmax.f32 %v718_v4, 0.0 }
 0x151   :  { %v675_v7 = vpop.f32.mrf.mxu2  ;;  %1389 = vmatpush.bf16.msra.mxu3 %v2167_v26 }
 0x152   :  { %v731_v9 = vpack.c.bf16 %v727_v6, %v723_v5  ;;  %v676_v10 = vadd.f32 %v675_v7, %v282_v61  ;;  %v689_v11 = vpop.f32.mrf.mxu3 }
 0x153   :  { %1374 = vmatpush.bf16.msra.mxu2 %v2160_v17 }
 0x154   :  { %v690_v12 = vadd.f32 %v689_v11, %v676_v10  ;;  %1172 = vmatmul.bf16.vlgmr.msrb.gmra.mxu1 %v731_v9  ;;  %1200 = vmatmul.bf16.vlgmr.msrb.gmra.mxu3 %v729_v45  ;;  %v2185_v10 = vld [vmem:[%s2507_s8] ss:$0 sm:$0xff] }
 0x155   :  { %1390 = vmatpush.bf16.msra.mxu3 %v2166_v27 }
 0x156   :  { %v726_v55 = vmax.f32 %v690_v12, 0.0 }
 0x157   :  { %1375 = vmatpush.bf16.msra.mxu2 %v2159_v18 }
 0x158   :  { %v730_v14 = vpack.c.bf16 %v726_v55, %v722_v13 }
 0x159   :  { %1391 = vmatpush.bf16.msra.mxu3 %v2165_v28 }
 0x15a   :  { %1158 = vmatmul.bf16.vlgmr.msrb.gmra.mxu0 %v730_v14  ;;  %1186 = vmatmul.bf16.vlgmr.msrb.gmra.mxu2 %v728_v58 }
 0x15b   :  { %1376 = vmatpush.bf16.msra.mxu2 %v2158_v19 }
 0x15d   :  { %1392 = vmatpush.bf16.msra.mxu3 %v2164_v32 }
 0x15f   :  { %1377 = vmatpush.bf16.msra.mxu2 %v2157_v21 }
 0x161   :  { %1393 = vmatpush.bf16.msra.mxu3 %v2163_v35 }
 0x163   :  { %1378 = vmatpush.bf16.msra.mxu2 %v2156_v23 }
 0x164   :  { %1228 = vmatmul.bf16.vlgmr.msra.gmra.mxu1 %v731_v9 }
 0x167   :  { %1379 = vmatpush.bf16.msra.mxu2 %v2155_v25 }
 0x16a   :  { %1214 = vmatmul.bf16.vlgmr.msra.gmra.mxu0 %v730_v14 }
 0x1c7   :  { %v1145_v30 = vpop.f32.mrf.mxu3 }
 0x1cd   :  { %v1131_v29 = vpop.f32.mrf.mxu2 }
 0x1ce   :  { %v1132_v37 = vadd.f32 %v1131_v29, %v798_v33 }
 0x1cf   :  { %v1147_v39 = vpop.f32.mrf.mxu3 }
 0x1d0   :  { %v1146_v41 = vadd.f32 %v1145_v30, %v1132_v37 }
 0x1d1   :  { %v1173_v34 = vpop.f32.mrf.mxu1 }
 0x1d5   :  { %v1133_v36 = vpop.f32.mrf.mxu2 }
 0x1d6   :  { %v1134_v40 = vadd.f32 %v1133_v36, %v798_v33 }
 0x1d7   :  { %v1159_v38 = vpop.f32.mrf.mxu0  ;;  %v1201_v51 = vpop.f32.mrf.mxu3 }
 0x1d8   :  { %v1160_v42 = vadd.f32 %v1159_v38, %v1146_v41  ;;  %v1148_v45 = vadd.f32 %v1147_v39, %v1134_v40 }
 0x1d9   :  { %v1175_v43 = vpop.f32.mrf.mxu1 }
 0x1da   :  { %v1174_v47 = vadd.f32 %v1173_v34, %v1160_v42 }
 0x1dc   :  { %v1234_v52 = vmax.f32 %v1174_v47, 0.0 }
 0x1dd   :  { %v1187_v44 = vpop.f32.mrf.mxu2 }
 0x1de   :  { %v1188_v54 = vadd.f32 %v1187_v44, %v799_v49 }
 0x1df   :  { %v1161_v46 = vpop.f32.mrf.mxu0  ;;  %v1203_v63 = vpop.f32.mrf.mxu3 }
 0x1e0   :  { %v1162_v48 = vadd.f32 %v1161_v46, %v1148_v45  ;;  %v1202_v61 = vadd.f32 %v1201_v51, %v1188_v54 }
 0x1e1   :  { %v1229_v57 = vpop.f32.mrf.mxu1 }
 0x1e2   :  { %v1176_v50 = vadd.f32 %v1175_v43, %v1162_v48 }
 0x1e4   :  { %v1236_v53 = vmax.f32 %v1176_v50, 0.0 }
 0x1e5   :  { %v1189_v58 = vpop.f32.mrf.mxu2 }
 0x1e6   :  { %v1238_v56 = vpack.c.bf16 %v1236_v53, %v1234_v52  ;;  %v1190_v60 = vadd.f32 %v1189_v58, %v799_v49 }
 0x1e7   :  { %v1215_v59 = vpop.f32.mrf.mxu0 }
 0x1e8   :  { %1380 = vmatmul.bf16.vlgmr.msra.gmra.mxu2 %v1238_v56  ;;  %v1216_v62 = vadd.f32 %v1215_v59, %v1202_v61  ;;  %v1204_v0 = vadd.f32 %v1203_v63, %v1190_v60 }
 0x1e9   :  { %v1231_v4 = vpop.f32.mrf.mxu1 }
 0x1ea   :  { %v1230_v2 = vadd.f32 %v1229_v57, %v1216_v62 }
 0x1ec   :  { %v1235_v6 = vmax.f32 %v1230_v2, 0.0 }
 0x1ef   :  { %v1217_v1 = vpop.f32.mrf.mxu0 }
 0x1f0   :  { %v1218_v3 = vadd.f32 %v1217_v1, %v1204_v0 }
 0x1f2   :  { %v1232_v5 = vadd.f32 %v1231_v4, %v1218_v3 }
 0x1f4   :  { %v1237_v7 = vmax.f32 %v1232_v5, 0.0 }
 0x1f6   :  { %v1239_v8 = vpack.c.bf16 %v1237_v7, %v1235_v6 }
 0x1f8   :  { %1394 = vmatmul.bf16.vlgmr.msra.gmra.mxu3 %v1239_v8 }
 0x26b   :  { %v1381_v9 = vpop.f32.mrf.mxu2 }
 0x26c   :  { %v1382_v11 = vadd.f32 %v2185_v10, %v1381_v9 }
 0x273   :  { %v1383_v55 = vpop.f32.mrf.mxu2 }
 0x274   :  { %v1384_v14 = vadd.f32 %v2185_v10, %v1383_v55 }
 0x27b   :  { %v1395_v12 = vpop.f32.mrf.mxu3 }
 0x27c   :  { %v1396_v13 = vadd.f32 %v1395_v12, %v1382_v11 }
 0x27e   :  { %1400 = vst [vmem:[#allocation14] sm:$0xff] %v1396_v13 }
 0x283   :  { %v1397_v15 = vpop.f32.mrf.mxu3 }
 0x284   :  { %v1398_v16 = vadd.f32 %v1397_v15, %v1384_v14 }
 0x286   :  { %1401 = vst [vmem:[#allocation14 + $0x8] sm:$0xff] %v1398_v16 }
 0x287   :  { %1414 = dma.vmem_to_hbm [thread:$0]  %s1407_s26, 256, %s1409_s29, [#allocation4], %s2389_s17, %s2389_s17, %s2390_s18  }
 0x288   :  { %2386 = dma.done.wait [#allocation4], 256  }
 0x289   :  { %2387 = vsyncadd [#allocation4], 4294967040 }
 0x28a   :  { %1419 = vsyncpa [#allocation3], 1 }
 0x28b   :  { %1420 = vsyncpa [#allocation6], 1 }
 0x28c   :  { %1421 = vsyncpa [#allocation9], 1 }
 0x28d   :  { %1422 = vsyncpa [#allocation12], 1 }
 0x28e   :  { %1423 = vsyncpa [#allocation4], 1 }

</bundles_post_ra>
